<compile_context>
chip_gen: v7x
topology: tpu7x:2x2x1
jax: 0.10.0
libtpu: 0.0.40
codegen_flags: <defaults>
</compile_context>

<pallas_src>
import functools
import math

import jax
import jax.numpy as jnp
from jax.experimental import pallas as pl
from jax.experimental.pallas import tpu as pltpu

_VMEM = pl.BlockSpec(memory_space=pltpu.MemorySpace.VMEM)


# ---------------------------------------------------------------------------
# Shared recurrent-cell math (fused-gate layout).
#
#   w_ih : (dim_in, G*H)    w_hh : (H, G*H)
#   RNN/LSTM: b = b_ih + b_hh                        (1, G*H)
#   GRU:      b_i = b_ih + [b_hh_r, b_hh_z, 0]       (1, 3H)
#             b_hn = b_hh_n                          (1, H)
#
# `gi` already contains the input projection + input-side bias (hoisted out of
# the serial recurrence); only h @ w_hh remains per step.  Matmuls run in
# `cdtype` with f32 accumulation; gate math stays f32.
# ---------------------------------------------------------------------------
def _rnn_update(gi, h, whh, cdtype):
    gh = jnp.dot(h.astype(cdtype), whh, preferred_element_type=jnp.float32)
    return jnp.tanh(gi + gh)


def _gru_update(gi, h, whh, b_hn, H, cdtype):
    # PyTorch GRUCell gate order: r, z, n
    gh = jnp.dot(h.astype(cdtype), whh, preferred_element_type=jnp.float32)
    r = jax.nn.sigmoid(gi[:, 0:H] + gh[:, 0:H])
    z = jax.nn.sigmoid(gi[:, H:2 * H] + gh[:, H:2 * H])
    n = jnp.tanh(gi[:, 2 * H:3 * H] + r * (gh[:, 2 * H:3 * H] + b_hn))
    return (1.0 - z) * n + z * h


def _lstm_update(gi, h, c, whh, H, cdtype):
    # PyTorch LSTMCell gate order: i, f, g, o (biases pre-summed into gi)
    zz = gi + jnp.dot(h.astype(cdtype), whh, preferred_element_type=jnp.float32)
    i = jax.nn.sigmoid(zz[:, 0:H])
    f = jax.nn.sigmoid(zz[:, H:2 * H])
    g = jnp.tanh(zz[:, 2 * H:3 * H])
    o = jax.nn.sigmoid(zz[:, 3 * H:4 * H])
    c_new = f * c + i * g
    h_new = o * jnp.tanh(c_new)
    return h_new, c_new


# ---------------------------------------------------------------------------
# Single-step kernels (== Normal_Cell.forward), whole arrays resident in VMEM.
# ---------------------------------------------------------------------------
def _rnn_step_kernel(y_ref, h_ref, wih_ref, whh_ref, b_ref, wn_ref,
                     out_ref, hnew_ref, *, cdtype):
    gi = jnp.dot(y_ref[...].astype(cdtype), wih_ref[...],
                 preferred_element_type=jnp.float32) + b_ref[...]
    h_new = _rnn_update(gi, h_ref[...], whh_ref[...], cdtype)
    hnew_ref[...] = h_new
    out_ref[...] = jnp.dot(h_new.astype(cdtype), wn_ref[...],
                           preferred_element_type=jnp.float32)


def _gru_step_kernel(y_ref, h_ref, wih_ref, whh_ref, bi_ref, bhn_ref, wn_ref,
                     out_ref, hnew_ref, *, cdtype, H):
    gi = jnp.dot(y_ref[...].astype(cdtype), wih_ref[...],
                 preferred_element_type=jnp.float32) + bi_ref[...]
    h_new = _gru_update(gi, h_ref[...], whh_ref[...], bhn_ref[...], H, cdtype)
    hnew_ref[...] = h_new
    out_ref[...] = jnp.dot(h_new.astype(cdtype), wn_ref[...],
                           preferred_element_type=jnp.float32)


def _lstm_step_kernel(y_ref, h_ref, c_ref, wih_ref, whh_ref, b_ref, wn_ref,
                      out_ref, hnew_ref, cnew_ref, *, cdtype, H):
    gi = jnp.dot(y_ref[...].astype(cdtype), wih_ref[...],
                 preferred_element_type=jnp.float32) + b_ref[...]
    h_new, c_new = _lstm_update(gi, h_ref[...], c_ref[...], whh_ref[...], H, cdtype)
    hnew_ref[...] = h_new
    cnew_ref[...] = c_new
    out_ref[...] = jnp.dot(h_new.astype(cdtype), wn_ref[...],
                           preferred_element_type=jnp.float32)


# ---------------------------------------------------------------------------
# Chunked rollout kernels: grid=(T//Tc,) ("arbitrary"); weights VMEM-resident
# via constant index_maps, state carried in VMEM scratch, Tc steps unrolled
# per grid iteration, input/output projections batched over the chunk.
# ---------------------------------------------------------------------------
def _rnn_roll_kernel(ys_ref, h0_ref, wih_ref, whh_ref, b_ref, wn_ref,
                     out_ref, hlast_ref, h_scr, hseq_scr, *, cdtype, Tc, B):
    @pl.when(pl.program_id(0) == 0)
    def _():
        h_scr[...] = h0_ref[...]

    whh = whh_ref[...]
    # Hoisted input projection for the whole chunk (bias included).
    gi_all = jnp.dot(ys_ref[...].astype(cdtype), wih_ref[...],
                     preferred_element_type=jnp.float32) + b_ref[...]

    h = h_scr[...]
    for t in range(Tc):                       # fully unrolled serial recurrence
        h = _rnn_update(gi_all[t * B:(t + 1) * B, :], h, whh, cdtype)
        hseq_scr[t * B:(t + 1) * B, :] = h
    h_scr[...] = h

    # Deferred output projection: one (Tc*B, H) x (H, Op) matmul per chunk.
    out_ref[...] = jnp.dot(hseq_scr[...].astype(cdtype), wn_ref[...],
                           preferred_element_type=jnp.float32)

    @pl.when(pl.program_id(0) == pl.num_programs(0) - 1)
    def _():
        hlast_ref[...] = h


def _gru_roll_kernel(ys_ref, h0_ref, wih_ref, whh_ref, bi_ref, bhn_ref, wn_ref,
                     out_ref, hlast_ref, h_scr, hseq_scr, *, cdtype, Tc, B, H):
    @pl.when(pl.program_id(0) == 0)
    def _():
        h_scr[...] = h0_ref[...]

    whh = whh_ref[...]
    b_hn = bhn_ref[...]
    gi_all = jnp.dot(ys_ref[...].astype(cdtype), wih_ref[...],
                     preferred_element_type=jnp.float32) + bi_ref[...]

    h = h_scr[...]
    for t in range(Tc):
        h = _gru_update(gi_all[t * B:(t + 1) * B, :], h, whh, b_hn, H, cdtype)
        hseq_scr[t * B:(t + 1) * B, :] = h
    h_scr[...] = h

    out_ref[...] = jnp.dot(hseq_scr[...].astype(cdtype), wn_ref[...],
                           preferred_element_type=jnp.float32)

    @pl.when(pl.program_id(0) == pl.num_programs(0) - 1)
    def _():
        hlast_ref[...] = h


def _lstm_roll_kernel(ys_ref, h0_ref, c0_ref, wih_ref, whh_ref, b_ref, wn_ref,
                      out_ref, hlast_ref, clast_ref,
                      h_scr, c_scr, hseq_scr, *, cdtype, Tc, B, H):
    @pl.when(pl.program_id(0) == 0)
    def _():
        h_scr[...] = h0_ref[...]
        c_scr[...] = c0_ref[...]

    whh = whh_ref[...]
    gi_all = jnp.dot(ys_ref[...].astype(cdtype), wih_ref[...],
                     preferred_element_type=jnp.float32) + b_ref[...]

    h = h_scr[...]
    c = c_scr[...]
    for t in range(Tc):
        h, c = _lstm_update(gi_all[t * B:(t + 1) * B, :], h, c, whh, H, cdtype)
        hseq_scr[t * B:(t + 1) * B, :] = h
    h_scr[...] = h
    c_scr[...] = c

    out_ref[...] = jnp.dot(hseq_scr[...].astype(cdtype), wn_ref[...],
                           preferred_element_type=jnp.float32)

    @pl.when(pl.program_id(0) == pl.num_programs(0) - 1)
    def _():
        hlast_ref[...] = h
        clast_ref[...] = c


# ---------------------------------------------------------------------------
# Module wrapper (deterministic PyTorch-style uniform(-1/sqrt(H), 1/sqrt(H)) init)
# ---------------------------------------------------------------------------
class NormalCell:
    def __init__(self, dim_in, dim_out, hidden_size, cell, key,
                 compute_dtype=jnp.float32):
        assert cell in ('RNN', 'GRU', 'LSTM')
        self.dim_in, self.dim_out, self.hidden = dim_in, dim_out, hidden_size
        self.cell = cell
        self.cdtype = compute_dtype
        G = self.ngates = {'RNN': 1, 'GRU': 3, 'LSTM': 4}[cell]
        H = hidden_size
        # Lane-dense output: pad dim_out up to a multiple of 128 (zero columns).
        self.o_pad = max(128, -(-dim_out // 128) * 128)

        k0, k1, k2, k3, k4 = jax.random.split(key, 5)
        stdv = 1.0 / math.sqrt(hidden_size)

        def u(k, shape):
            return jax.random.uniform(k, shape, jnp.float32, -stdv, stdv)

        # Fused-gate layout: (in_features, G*H); per-gate access is a static
        # lane-axis slice (H % 128 == 0 keeps it vreg-aligned in production).
        self.w_ih = u(k0, (dim_in, G * H)).astype(compute_dtype)
        self.w_hh = u(k1, (H, G * H)).astype(compute_dtype)
        b_ih = u(k2, (1, G * H))
        b_hh = u(k3, (1, G * H))
        if cell == 'GRU':
            # Pre-sum hidden-side bias into r/z gates; only b_hh(n) stays
            # inside the recurrence (it is multiplied by r in PyTorch GRU).
            self.b_i = b_ih.at[:, :2 * H].add(b_hh[:, :2 * H])
            self.b_hn = b_hh[:, 2 * H:3 * H]
        else:
            # RNN / LSTM: biases only ever appear summed -> pre-add once.
            self.b = b_ih + b_hh
        # Wn: Linear(hidden, dim_out, bias=False), stored transposed and
        # zero-padded to o_pad lanes for unmasked lane-dense stores.
        wn = u(k4, (H, dim_out))
        self.wn = jnp.zeros((H, self.o_pad), compute_dtype
                            ).at[:, :dim_out].set(wn.astype(compute_dtype))

    # ---------------- VMEM budget for the rollout pallas_call ----------------
    def _rollout_vmem_limit(self, Tc, B, D):
        it = jnp.dtype(self.cdtype).itemsize
        G, H, Op = self.ngates, self.hidden, self.o_pad
        weights = it * (D * G * H + H * G * H + H * Op) + 4 * (G * H + H)
        stream = 4 * 2 * Tc * B * (D + Op)        # double-buffered ys + out
        state = 4 * B * H * (6 + Tc)              # h0/c0, hlast/clast, scratch
        limit = 2 * (weights + stream + state) + (4 << 20)
        return int(min(max(limit, 32 << 20), 64 << 20))

    @staticmethod
    def _pick_chunk(T, target):
        for tc in range(min(T, target), 0, -1):
            if T % tc == 0:
                return tc
        return 1

    # ---------------- single step: matches Normal_Cell.forward ----------------
    def __call__(self, hs, state, y):
        """Matches Normal_Cell.forward(hs, state, y); `hs` is unused."""
        del hs
        B = y.shape[0]
        H, O, Op = self.hidden, self.dim_out, self.o_pad
        f32 = jnp.float32

        if self.cell == 'LSTM':
            h, c = state
            out, h_new, c_new = pl.pallas_call(
                functools.partial(_lstm_step_kernel, cdtype=self.cdtype, H=H),
                out_shape=(jax.ShapeDtypeStruct((B, Op), f32),
                           jax.ShapeDtypeStruct((B, H), f32),
                           jax.ShapeDtypeStruct((B, H), f32)),
                in_specs=[_VMEM] * 7,
                out_specs=(_VMEM, _VMEM, _VMEM),
            )(y, h, c, self.w_ih, self.w_hh, self.b, self.wn)
            return out[:, :O], (h_new, c_new)

        if self.cell == 'GRU':
            h = state
            out, h_new = pl.pallas_call(
                functools.partial(_gru_step_kernel, cdtype=self.cdtype, H=H),
                out_shape=(jax.ShapeDtypeStruct((B, Op), f32),
                           jax.ShapeDtypeStruct((B, H), f32)),
                in_specs=[_VMEM] * 7,
                out_specs=(_VMEM, _VMEM),
            )(y, h, self.w_ih, self.w_hh, self.b_i, self.b_hn, self.wn)
            return out[:, :O], h_new

        h = state
        out, h_new = pl.pallas_call(
            functools.partial(_rnn_step_kernel, cdtype=self.cdtype),
            out_shape=(jax.ShapeDtypeStruct((B, Op), f32),
                       jax.ShapeDtypeStruct((B, H), f32)),
            in_specs=[_VMEM] * 6,
            out_specs=(_VMEM, _VMEM),
        )(y, h, self.w_ih, self.w_hh, self.b, self.wn)
        return out[:, :O], h_new

    # ---------------- chunked T-step decode loop in ONE pallas_call ----------------
    def rollout(self, hs, state, ys, chunk=8):
        """Equivalent to looping forward() over ys[t]; returns (outs[T,B,O], state).
        Weights DMA'd once and kept VMEM-resident, Tc timesteps per grid step,
        input/Wn projections batched over each chunk, only h@w_hh serial."""
        del hs
        T, B, D = ys.shape
        H, G, O, Op = self.hidden, self.ngates, self.dim_out, self.o_pad
        f32 = jnp.float32
        Tc = self._pick_chunk(T, chunk)
        n_chunks = T // Tc

        ys_flat = ys.reshape(T * B, D)              # free reshape in the wrapper

        c2 = lambda i: (0, 0)
        y_spec = pl.BlockSpec((Tc * B, D), lambda i: (i, 0))
        out_spec = pl.BlockSpec((Tc * B, Op), lambda i: (i, 0))
        st_spec = pl.BlockSpec((B, H), c2)
        wih_spec = pl.BlockSpec((D, G * H), c2)
        whh_spec = pl.BlockSpec((H, G * H), c2)
        wn_spec = pl.BlockSpec((H, Op), c2)
        bg_spec = pl.BlockSpec((1, G * H), c2)
        bh_spec = pl.BlockSpec((1, H), c2)

        cp = pltpu.CompilerParams(
            dimension_semantics=("arbitrary",),
            vmem_limit_bytes=self._rollout_vmem_limit(Tc, B, D))

        if self.cell == 'LSTM':
            h, c = state
            outs, h_last, c_last = pl.pallas_call(
                functools.partial(_lstm_roll_kernel, cdtype=self.cdtype,
                                  Tc=Tc, B=B, H=H),
                grid=(n_chunks,),
                out_shape=(jax.ShapeDtypeStruct((T * B, Op), f32),
                           jax.ShapeDtypeStruct((B, H), f32),
                           jax.ShapeDtypeStruct((B, H), f32)),
                in_specs=[y_spec, st_spec, st_spec,
                          wih_spec, whh_spec, bg_spec, wn_spec],
                out_specs=(out_spec, st_spec, st_spec),
                scratch_shapes=[pltpu.VMEM((B, H), f32),
                                pltpu.VMEM((B, H), f32),
                                pltpu.VMEM((Tc * B, H), f32)],
                compiler_params=cp,
            )(ys_flat, h, c, self.w_ih, self.w_hh, self.b, self.wn)
            return outs[:, :O].reshape(T, B, O), (h_last, c_last)

        if self.cell == 'GRU':
            h = state
            outs, h_last = pl.pallas_call(
                functools.partial(_gru_roll_kernel, cdtype=self.cdtype,
                                  Tc=Tc, B=B, H=H),
                grid=(n_chunks,),
                out_shape=(jax.ShapeDtypeStruct((T * B, Op), f32),
                           jax.ShapeDtypeStruct((B, H), f32)),
                in_specs=[y_spec, st_spec,
                          wih_spec, whh_spec, bg_spec, bh_spec, wn_spec],
                out_specs=(out_spec, st_spec),
                scratch_shapes=[pltpu.VMEM((B, H), f32),
                                pltpu.VMEM((Tc * B, H), f32)],
                compiler_params=cp,
            )(ys_flat, h, self.w_ih, self.w_hh, self.b_i, self.b_hn, self.wn)
            return outs[:, :O].reshape(T, B, O), h_last

        h = state
        outs, h_last = pl.pallas_call(
            functools.partial(_rnn_roll_kernel, cdtype=self.cdtype, Tc=Tc, B=B),
            grid=(n_chunks,),
            out_shape=(jax.ShapeDtypeStruct((T * B, Op), f32),
                       jax.ShapeDtypeStruct((B, H), f32)),
            in_specs=[y_spec, st_spec, wih_spec, whh_spec, bg_spec, wn_spec],
            out_specs=(out_spec, st_spec),
            scratch_shapes=[pltpu.VMEM((B, H), f32),
                            pltpu.VMEM((Tc * B, H), f32)],
            compiler_params=cp,
        )(ys_flat, h, self.w_ih, self.w_hh, self.b, self.wn)
        return outs[:, :O].reshape(T, B, O), h_last

    # ---------------- pure-JAX references (f32 math) ----------------
    def reference(self, hs, state, y):
        del hs
        H, O = self.hidden, self.dim_out
        w_ih = self.w_ih.astype(jnp.float32)
        w_hh = self.w_hh.astype(jnp.float32)
        wn = self.wn.astype(jnp.float32)[:, :O]
        if self.cell == 'RNN':
            h = state
            h_new = jnp.tanh(y @ w_ih + h @ w_hh + self.b)
            return h_new @ wn, h_new
        if self.cell == 'GRU':
            h = state
            gi = y @ w_ih + self.b_i
            gh = h @ w_hh
            r = jax.nn.sigmoid(gi[:, :H] + gh[:, :H])
            z = jax.nn.sigmoid(gi[:, H:2 * H] + gh[:, H:2 * H])
            n = jnp.tanh(gi[:, 2 * H:] + r * (gh[:, 2 * H:] + self.b_hn))
            h_new = (1.0 - z) * n + z * h
            return h_new @ wn, h_new
        h, c = state
        zz = y @ w_ih + h @ w_hh + self.b
        i = jax.nn.sigmoid(zz[:, :H])
        f = jax.nn.sigmoid(zz[:, H:2 * H])
        g = jnp.tanh(zz[:, 2 * H:3 * H])
        o = jax.nn.sigmoid(zz[:, 3 * H:])
        c_new = f * c + i * g
        h_new = o * jnp.tanh(c_new)
        return h_new @ wn, (h_new, c_new)

    def reference_rollout(self, hs, state, ys):
        outs = []
        for t in range(ys.shape[0]):
            o, state = self.reference(hs, state, ys[t])
            outs.append(o)
        return jnp.stack(outs, 0), state


# ---------------------------------------------------------------------------
if __name__ == "__main__":
    B, T, dim_in, dim_out, hidden = 8, 16, 4, 8, 32
    key = jax.random.PRNGKey(0)
    k_y, k_h, k_c, k_hs, k_p = jax.random.split(key, 5)

    ys = jax.random.normal(k_y, (T, B, dim_in), jnp.float32)
    y = ys[0]
    h0 = jax.random.normal(k_h, (B, hidden), jnp.float32)
    c0 = jax.random.normal(k_c, (B, hidden), jnp.float32)
    hs = jax.random.normal(k_hs, (B, 1, hidden), jnp.float32)  # unused by forward

    def close(a, b, tol):
        return bool(jnp.allclose(a, b, atol=tol, rtol=tol))

    ok = True
    for cell in ('RNN', 'GRU', 'LSTM'):
        state = (h0, c0) if cell == 'LSTM' else h0

        # f32 module: PyTorch-level numerics.
        mod = NormalCell(dim_in, dim_out, hidden, cell, k_p)

        # ---- single step (== Normal_Cell.forward) ----
        out, new_state = mod(hs, state, y)
        jax.block_until_ready(out)
        ref_out, ref_state = mod.reference(hs, state, y)
        ok &= close(out, ref_out, 1e-5)
        if cell == 'LSTM':
            ok &= close(new_state[0], ref_state[0], 1e-5)
            ok &= close(new_state[1], ref_state[1], 1e-5)
        else:
            ok &= close(new_state, ref_state, 1e-5)

        # ---- chunked T-step rollout (one pallas_call, weights VMEM-resident) ----
        outs, fin = mod.rollout(hs, state, ys, chunk=8)
        jax.block_until_ready(outs)
        r_outs, r_fin = mod.reference_rollout(hs, state, ys)
        ok &= close(outs, r_outs, 1e-4)
        if cell == 'LSTM':
            ok &= close(fin[0], r_fin[0], 1e-4)
            ok &= close(fin[1], r_fin[1], 1e-4)
        else:
            ok &= close(fin, r_fin, 1e-4)

        # ---- bf16-matmul variant (valid on v5e/v6e/v7x; f32 accumulation) ----
        mod_bf = NormalCell(dim_in, dim_out, hidden, cell, k_p,
                            compute_dtype=jnp.bfloat16)
        out_b, _ = mod_bf(hs, state, y)
        jax.block_until_ready(out_b)
        ref_b, _ = mod_bf.reference(hs, state, y)
        ok &= close(out_b, ref_b, 5e-2)

        outs_b, _ = mod_bf.rollout(hs, state, ys, chunk=8)
        jax.block_until_ready(outs_b)
        r_outs_b, _ = mod_bf.reference_rollout(hs, state, ys)
        ok &= close(outs_b, r_outs_b, 1e-1)

    print("KERNEL_OK" if ok else "KERNEL_MISMATCH")
</pallas_src>

<mosaic_0001>
module attributes {stable_mosaic.version = 11 : i64} {
  func.func @_rnn_step_kernel(%arg0: memref<8x4xf32, #tpu.memory_space<vmem>>, %arg1: memref<8x32xf32, #tpu.memory_space<vmem>>, %arg2: memref<4x32xf32, #tpu.memory_space<vmem>>, %arg3: memref<32x32xf32, #tpu.memory_space<vmem>>, %arg4: memref<1x32xf32, #tpu.memory_space<vmem>>, %arg5: memref<32x128xf32, #tpu.memory_space<vmem>>, %arg6: memref<8x128xf32, #tpu.memory_space<vmem>>, %arg7: memref<8x32xf32, #tpu.memory_space<vmem>>) attributes {dimension_semantics = [], scalar_prefetch = 0 : i64, scratch_operands = 0 : i64, tpu.core_type = #tpu.core_type<tc>} {
    %c0 = arith.constant 0 : index
    %c0_0 = arith.constant 0 : index
    %0 = vector.load %arg0[%c0, %c0_0] : memref<8x4xf32, #tpu.memory_space<vmem>>, vector<8x4xf32>
    %c0_1 = arith.constant 0 : index
    %c0_2 = arith.constant 0 : index
    %1 = vector.load %arg2[%c0_1, %c0_2] : memref<4x32xf32, #tpu.memory_space<vmem>>, vector<4x32xf32>
    %cst = arith.constant dense<0.000000e+00> : vector<8x32xf32>
    %2 = tpu.matmul %0, %1, %cst {dimension_numbers = #tpu.dot_dimension_numbers<[1], [0], [0], [1], [0, 0, 1, 1], [], []>} : vector<8x4xf32>, vector<4x32xf32>, vector<8x32xf32> -> vector<8x32xf32>
    %c0_3 = arith.constant 0 : index
    %c0_4 = arith.constant 0 : index
    %3 = vector.load %arg4[%c0_3, %c0_4] : memref<1x32xf32, #tpu.memory_space<vmem>>, vector<1x32xf32>
    %4 = vector.broadcast %3 : vector<1x32xf32> to vector<8x32xf32>
    %5 = arith.addf %2, %4 : vector<8x32xf32>
    %c0_5 = arith.constant 0 : index
    %c0_6 = arith.constant 0 : index
    %6 = vector.load %arg1[%c0_5, %c0_6] : memref<8x32xf32, #tpu.memory_space<vmem>>, vector<8x32xf32>
    %c0_7 = arith.constant 0 : index
    %c0_8 = arith.constant 0 : index
    %7 = vector.load %arg3[%c0_7, %c0_8] : memref<32x32xf32, #tpu.memory_space<vmem>>, vector<32x32xf32>
    %cst_9 = arith.constant dense<0.000000e+00> : vector<8x32xf32>
    %8 = tpu.matmul %6, %7, %cst_9 {dimension_numbers = #tpu.dot_dimension_numbers<[1], [0], [0], [1], [0, 0, 1, 1], [], []>} : vector<8x32xf32>, vector<32x32xf32>, vector<8x32xf32> -> vector<8x32xf32>
    %9 = arith.addf %5, %8 : vector<8x32xf32>
    %10 = math.tanh %9 : vector<8x32xf32>
    %c0_10 = arith.constant 0 : index
    %c0_11 = arith.constant 0 : index
    %11 = vector.load %arg7[%c0_10, %c0_11] : memref<8x32xf32, #tpu.memory_space<vmem>>, vector<8x32xf32>
    tpu.vector_store %arg7[%c0_10, %c0_11], %10 {strides = array<i32>} : memref<8x32xf32, #tpu.memory_space<vmem>>, vector<8x32xf32>,
    %c0_12 = arith.constant 0 : index
    %c0_13 = arith.constant 0 : index
    %12 = vector.load %arg5[%c0_12, %c0_13] : memref<32x128xf32, #tpu.memory_space<vmem>>, vector<32x128xf32>
    %cst_14 = arith.constant dense<0.000000e+00> : vector<8x128xf32>
    %13 = tpu.matmul %10, %12, %cst_14 {dimension_numbers = #tpu.dot_dimension_numbers<[1], [0], [0], [1], [0, 0, 1, 1], [], []>} : vector<8x32xf32>, vector<32x128xf32>, vector<8x128xf32> -> vector<8x128xf32>
    %c0_15 = arith.constant 0 : index
    %c0_16 = arith.constant 0 : index
    %14 = vector.load %arg6[%c0_15, %c0_16] : memref<8x128xf32, #tpu.memory_space<vmem>>, vector<8x128xf32>
    tpu.vector_store %arg6[%c0_15, %c0_16], %13 {strides = array<i32>} : memref<8x128xf32, #tpu.memory_space<vmem>>, vector<8x128xf32>,
    return
  }
}

</mosaic_0001>

<bundles_post_ra>
// kernel: tpu_custom_call.1
= control target key start
LH: loop header
LB: loop body
LE: loop exit
PB: predicated region body
PF: predicated region fallthrough
CT: control target
= control target key end

     0   :  { %13 = vsyncpa [#allocation3], 0  ;;  %s613_s0 = inlined_call_operand.vmem [shape: f32[8,4], index: 0, kind: input, shape index: {}]   ;;  %s614_s1 = inlined_call_operand.vmem [shape: f32[8,32], index: 1, kind: input, shape index: {}]   ;;  %s615_s2 = inlined_call_operand.vmem [shape: f32[4,32], index: 2, kind: input, shape index: {}]   ;;  %s616_s3 = inlined_call_operand.hbm [shape: f32[32,32], index: 3, kind: input, shape index: {}]   ;;  %s617_s4 = inlined_call_operand.vmem [shape: f32[1,32], index: 4, kind: input, shape index: {}]   ;;  %s618_s5 = inlined_call_operand.hbm [shape: f32[32,128], index: 5, kind: input, shape index: {}]   ;;  %s619_s6 = inlined_call_operand.hbm [shape: f32[8,128], index: 6, kind: output, shape index: {0}]   ;;  %s620_s7 = inlined_call_operand.hbm [shape: f32[8,32], index: 7, kind: output, shape index: {1}]  }
   0x1   :  { %14 = vsyncpa [#allocation6], 0 }
   0x2   :  { %15 = vsyncpa [#allocation4], 0 }
   0x3   :  { %16 = vsyncpa [#allocation9], 0  ;;  %s498_s24 = smov [#allocation2]   ;;  %s402_s28 = scalar_lea.hbm %s616_s3, 512 }
   0x4   :  { %s28_s25 = sshll.u32 %s498_s24, 4  ;;  %p403_p0 = scmp.ne.s32.totalorder %s616_s3, %s402_s28  ;;  %s29_s25 = int_to_ptr.vmem [resolvable:$true] %s28_s25 }
   0x5   :  { %p406_p1 = scmp.lt.u32.totalorder %s402_s28, %s616_s3 }
   0x7   :  { %p408_p2 = pnand %p406_p1, %p403_p0 }
   0x9   :  { %411 = shalt.err (!%p408_p2)
}
   0xa   :  { %s412_s10 = scalar_lea.vmem %s29_s25, 512  ;;  %p417_p4 = scmp.lt.s32.totalorder %s29_s25, %s29_s25 }
   0xb   :  { %p413_p3 = scmp.ne.s32.totalorder %s29_s25, %s412_s10  ;;  %p418_p5 = scmp.lt.s32.totalorder %s412_s10, %s412_s10 }
   0xd   :  { %p419_p6 = por %p418_p5, %p417_p4 }
   0xf   :  { %p420_p7 = pnand %p419_p6, %p413_p3 }
  0x11   :  { %423 = shalt.err (!%p420_p7)
}
  0x12   :  { %s499_s11 = smov 128   ;;  %s500_s12 = smov 8  }
  0x13   :  { %34 = dma.hbm_to_vmem [thread:$0]  %s616_s3, 512, %s29_s25, [#allocation3], %s499_s11, %s499_s11, %s500_s12  }
  0x14   :  { %s501_s15 = smov [#allocation5]   ;;  %s424_s19 = scalar_lea.hbm %s618_s5, 512 }
  0x15   :  { %s42_s16 = sshll.u32 %s501_s15, 4  ;;  %p425_p8 = scmp.ne.s32.totalorder %s618_s5, %s424_s19  ;;  %s43_s16 = int_to_ptr.vmem [resolvable:$true] %s42_s16 }
  0x16   :  { %p428_p9 = scmp.lt.u32.totalorder %s424_s19, %s618_s5 }
  0x18   :  { %p430_p10 = pnand %p428_p9, %p425_p8 }
  0x1a   :  { %433 = shalt.err (!%p430_p10)
}
  0x1b   :  { %s434_s24 = scalar_lea.vmem %s43_s16, 512  ;;  %p439_p12 = scmp.lt.s32.totalorder %s43_s16, %s43_s16 }
  0x1c   :  { %p435_p11 = scmp.ne.s32.totalorder %s43_s16, %s434_s24  ;;  %p440_p13 = scmp.lt.s32.totalorder %s434_s24, %s434_s24 }
  0x1e   :  { %p441_p0 = por %p440_p13, %p439_p12 }
  0x20   :  { %p442_p1 = pnand %p441_p0, %p435_p11 }
  0x22   :  { %445 = shalt.err (!%p442_p1)
}
  0x23   :  { %48 = dma.hbm_to_vmem [thread:$0]  %s618_s5, 512, %s43_s16, [#allocation6], %s499_s11, %s499_s11, %s500_s12  }
  0x24   :  { %490 = dma.done.wait [#allocation3], 512  }
  0x25   :  { %491 = vsyncadd [#allocation3], 4294966784 }
  0x26   :  { %492 = dma.done.wait [#allocation6], 512  }
  0x27   :  { %493 = vsyncadd [#allocation6], 4294966784  ;;  %v502_v0 = vmov 0.0   ;;  %vm503_vm0 = vmmov 0   ;;  %v504_v1 = vmov 0.0|0.0   ;;  %vm68_vm1 = vcmask 1043456  }
  0x28   :  { %349 = vmatprep.subr.mxu0 %v502_v0  ;;  %351 = vmatprep.mubr.msk.f32.mxu0 %vm503_vm0, %v502_v0  ;;  %vm64_vm2 = vcmask 31744   ;;  %v56_v2 = vld [vmem:[%s615_s2] sm:$0xf]  ;;  %v143_v4 = vld [vmem:[#allocation2] sm:$0xff]  ;;  %v144_v5 = vld [vmem:[#allocation2 + $0x8] sm:$0xff]  ;;  %vm147_vm3 = vcmask 261120  }
  0x29   :  { %382 = vmatprep.subr.bf16.mxu1 %v504_v1  ;;  %373 = vmatprep.mubr.msk.f32.mxu1 %vm503_vm0, %v502_v0  ;;  %v55_v3 = vld [vmem:[%s613_s0] sm:$0xff]  ;;  %v145_v6 = vld [vmem:[#allocation2 + $0x10] sm:$0xff]  ;;  %v377_v8 = vpack.c.bf16 %v144_v5, %v143_v4  ;;  %v224_v11 = vld [vmem:[#allocation5] sm:$0xff] }
  0x2a   :  { %350 = vmatpush3.msk.msra.mxu0 %vm68_vm1, %v56_v2  ;;  %v146_v7 = vld [vmem:[#allocation2 + $0x18] sm:$0xff]  ;;  %v225_v12 = vld [vmem:[#allocation5 + $0x8] sm:$0xff]  ;;  %v226_v14 = vld [vmem:[#allocation5 + $0x10] sm:$0xff] }
  0x2b   :  { %352 = vmatmul.mubr.msk.f32.vlgmr.msra.gmra.mrb[0].mxu0 %vm64_vm2, %v55_v3  ;;  %376 = vmatprep.subr.bf16.mxu0 %v504_v1  ;;  %v380_v9 = vpack.c.bf16 %v146_v7, %v145_v6  ;;  %v142_v10 = vld [vmem:[%s614_s1] sm:$0xff]  ;;  %v383_v13 = vpack.c.bf16 %v225_v12, %v224_v11  ;;  %s505_s1 = smov [#allocation8]  }
  0x2c   :  { %362 = vmatprep.mubr.msk.f32.mxu0 %vm503_vm0, %v502_v0  ;;  %378 = vmatpush3.bf16.msra.mxu0 %v377_v8  ;;  %v227_v15 = vld [vmem:[#allocation5 + $0x18] sm:$0xff]  ;;  %s318_s8 = sshll.u32 %s505_s1, 4  ;;  %s319_s8 = int_to_ptr.vmem [resolvable:$true] %s318_s8 }
  0x2d   :  { %379 = vmatprep.subr.bf16.mxu0 %v504_v1  ;;  %384 = vmatpush3.bf16.msra.mxu1 %v383_v13  ;;  %v386_v16 = vpack.c.bf16 %v227_v15, %v226_v14  ;;  %v332_v17 = vld [vmem:[%s617_s4] ss:$0 sm:$0xff]  ;;  %s446_s9 = scalar_lea.vmem %s319_s8, 128  ;;  %p451_p3 = scmp.lt.s32.totalorder %s319_s8, %s319_s8 }
  0x2e   :  { %385 = vmatprep.subr.bf16.mxu1 %v504_v1  ;;  %p447_p2 = scmp.ne.s32.totalorder %s319_s8, %s446_s9  ;;  %p452_p4 = scmp.lt.s32.totalorder %s446_s9, %s446_s9 }
  0x30   :  { %381 = vmatpush3.bf16.msra.mxu0 %v380_v9  ;;  %p453_p5 = por %p452_p4, %p451_p3 }
  0x31   :  { %387 = vmatpush3.bf16.msra.mxu1 %v386_v16 }
  0x32   :  { %p454_p6 = pnand %p453_p5, %p447_p2 }
  0x33   :  { %363 = vmatmul.mubr.msk.f32.vlgmr.msra.gmra.mrb[0].mxu0 %vm147_vm3, %v142_v10 }
 0x106   :  { %v217_v18 = vpop.f32.mrb[0].mxu0 }
 0x107   :  { %v388_v19 = vadd.f32 %v332_v17, %v217_v18  ;;  %v364_v20 = vpop.f32.mrb[1].mxu0 }
 0x109   :  { %400 = vtanh.f32 %v388_v19 }
 0x113   :  { %v401_v21 = vpop.eup %400 }
 0x114   :  { %223 = vst.msk [vmem:[#allocation8] sm:$0xff] %vm147_vm3, %v401_v21  ;;  %374 = vmatmul.mubr.msk.f32.vlgmr.msra.gmra.mrb[0].mxu1 %vm147_vm3, %v401_v21 }
 0x115   :  { %457 = shalt.err (!%p454_p6)
}
 0x116   :  { %s458_s11 = scalar_lea.hbm %s620_s7, 128 }
 0x117   :  { %p459_p7 = scmp.ne.s32.totalorder %s620_s7, %s458_s11  ;;  %p462_p8 = scmp.lt.u32.totalorder %s458_s11, %s620_s7 }
 0x119   :  { %p464_p9 = pnand %p462_p8, %p459_p7 }
 0x11b   :  { %467 = shalt.err (!%p464_p9)
}
 0x11c   :  { %321 = dma.vmem_to_hbm [thread:$0]  %s319_s8, 128, %s620_s7, [#allocation9]  }
 0x11d   :  { %s506_s18 = smov [#allocation7]  }
 0x11e   :  { %s308_s19 = sshll.u32 %s506_s18, 4  ;;  %s309_s19 = int_to_ptr.vmem [resolvable:$true] %s308_s19 }
 0x11f   :  { %s468_s20 = scalar_lea.vmem %s309_s19, 128  ;;  %p473_p11 = scmp.lt.s32.totalorder %s309_s19, %s309_s19 }
 0x120   :  { %p469_p10 = scmp.ne.s32.totalorder %s309_s19, %s468_s20  ;;  %p474_p12 = scmp.lt.s32.totalorder %s468_s20, %s468_s20 }
 0x122   :  { %p475_p13 = por %p474_p12, %p473_p11 }
 0x124   :  { %p476_p0 = pnand %p475_p13, %p469_p10 }
 0x1e7   :  { %v297_v22 = vpop.f32.mrb[0].mxu1 }
 0x1e8   :  { %301 = vst [vmem:[#allocation7] sm:$0xff] %v297_v22  ;;  %v375_v23 = vpop.f32.mrb[1].mxu1 }
 0x1e9   :  { %479 = shalt.err (!%p476_p0)
}
 0x1ea   :  { %s480_s23 = scalar_lea.hbm %s619_s6, 128 }
 0x1eb   :  { %p481_p1 = scmp.ne.s32.totalorder %s619_s6, %s480_s23  ;;  %p484_p2 = scmp.lt.u32.totalorder %s480_s23, %s619_s6 }
 0x1ed   :  { %p486_p3 = pnand %p484_p2, %p481_p1 }
 0x1ef   :  { %489 = shalt.err (!%p486_p3)
}
 0x1f0   :  { %311 = dma.vmem_to_hbm [thread:$0]  %s309_s19, 128, %s619_s6, [#allocation4]  }
 0x1f1   :  { %494 = dma.done.wait [#allocation4], 128  }
 0x1f2   :  { %495 = vsyncadd [#allocation4], 4294967168 }
 0x1f3   :  { %496 = dma.done.wait [#allocation9], 128  }
 0x1f4   :  { %497 = vsyncadd [#allocation9], 4294967168 }
 0x1f5   :  { %328 = vsyncpa [#allocation3], 1 }
 0x1f6   :  { %329 = vsyncpa [#allocation6], 1 }
 0x1f7   :  { %330 = vsyncpa [#allocation4], 1 }
 0x1f8   :  { %331 = vsyncpa [#allocation9], 1 }

</bundles_post_ra>
